<compile_context>
chip_gen: v7x
topology: tpu7x:2x2x1
jax: 0.10.0
libtpu: 0.0.40
codegen_flags: <defaults>
</compile_context>

<pallas_src>
import functools

import numpy as np
import jax
import jax.numpy as jnp
from jax.experimental import pallas as pl
from jax.experimental.pallas import tpu as pltpu

LANE = 128


def _round_up(n, m):
    return ((n + m - 1) // m) * m


def scgnn_kernel(x_ref, a_ref, w1_ref, b1_ref, w2_ref, b2_ref, o_ref, h1_ref, *,
                 sensors):
    """relu(Â(X W1)+b1) -> Â(H W2)+b2 with Â = block_diag(Â_S, I)."""
    S = sensors
    bf16 = jnp.bfloat16
    f32 = jnp.float32

    x = x_ref[...]        # (N, F_in)   bf16
    a = a_ref[...]        # (S, S)      bf16  (normalized graph block)
    w1 = w1_ref[...]      # (F_in, F_hid) bf16
    w2 = w2_ref[...]      # (F_hid, F_out) bf16
    b1 = b1_ref[...]      # (1, F_hid)  f32
    b2 = b2_ref[...]      # (1, F_out)  f32

    # ---- Layer 1: relu( Â (X W1) + b1 ) ------------------------------------
    xw = jnp.dot(x, w1, preferred_element_type=f32)                     # (N, F_hid)
    top = jnp.dot(a, xw[:S, :].astype(bf16), preferred_element_type=f32)
    h1_ref[:S, :] = jnp.maximum(top + b1, 0.0).astype(bf16)             # graph rows
    h1_ref[S:, :] = jnp.maximum(xw[S:, :] + b1, 0.0).astype(bf16)       # identity rows

    # ---- Layer 2: Â (H1 W2) + b2 -------------------------------------------
    hw = jnp.dot(h1_ref[...], w2, preferred_element_type=f32)           # (N, F_out)
    top2 = jnp.dot(a, hw[:S, :].astype(bf16), preferred_element_type=f32)
    o_ref[:S, :] = (top2 + b2).astype(o_ref.dtype)
    o_ref[S:, :] = (hw[S:, :] + b2).astype(o_ref.dtype)


def build_normalized_adjacency(edge_index, sensors):
    """Precompute Â_S = D^-1/2 (A_S + I) D^-1/2 over the first `sensors` nodes.

    Rows/cols >= sensors of the full Â are identity (self-loop only) and are
    handled structurally inside the kernel.  Call this once per graph.
    """
    src = edge_index[0]
    dst = edge_index[1]
    A = jnp.zeros((sensors, sensors), jnp.float32)
    A = A.at[dst, src].add(1.0)                       # message src -> dst
    A = A + jnp.eye(sensors, dtype=jnp.float32)       # self loops
    deg = jnp.sum(A, axis=1)
    dinv = jax.lax.rsqrt(deg)
    return dinv[:, None] * A * dinv[None, :]


def prepare_params(params, *, x_dim, hidden, y_dim):
    """Zero-pad weights/biases to lane-dense (multiple-of-128) widths.

    Weights go to bf16 for the MXU; biases stay f32 (added on the VPU).
    Call once per parameter set.
    """
    w1, b1, w2, b2 = params
    f_in = _round_up(x_dim, LANE)
    f_hid = _round_up(hidden, LANE)
    f_out = _round_up(y_dim, LANE)
    w1p = jnp.zeros((f_in, f_hid), jnp.float32).at[:x_dim, :hidden].set(w1)
    w2p = jnp.zeros((f_hid, f_out), jnp.float32).at[:hidden, :y_dim].set(w2)
    b1p = jnp.zeros((1, f_hid), jnp.float32).at[:, :hidden].set(b1.reshape(1, hidden))
    b2p = jnp.zeros((1, f_out), jnp.float32).at[:, :y_dim].set(b2.reshape(1, y_dim))
    return w1p.astype(jnp.bfloat16), b1p, w2p.astype(jnp.bfloat16), b2p


def scgnn_forward(x_input, a_norm, padded_params, *, sensors, x_dim, y_dim):
    """Pallas implementation of SCGNNModel.forward (a_norm / params precomputed)."""
    w1p, b1p, w2p, b2p = padded_params
    f_in, f_hid = w1p.shape
    f_out = w2p.shape[1]
    B = x_input.shape[0]
    N = B * sensors

    # (B, x, S) -> (B, S, x) -> (N, x), zero-pad features to 128 lanes, bf16.
    X = jnp.transpose(x_input, (0, 2, 1)).reshape(N, x_dim)
    Xp = jnp.zeros((N, f_in), jnp.float32).at[:, :x_dim].set(X).astype(jnp.bfloat16)
    Ab = a_norm.astype(jnp.bfloat16)

    kernel = functools.partial(scgnn_kernel, sensors=sensors)
    out = pl.pallas_call(
        kernel,
        out_shape=jax.ShapeDtypeStruct((N, f_out), jnp.float32),
        grid=(1,),
        in_specs=[
            pl.BlockSpec((N, f_in), lambda i: (0, 0)),
            pl.BlockSpec((sensors, sensors), lambda i: (0, 0)),
            pl.BlockSpec((f_in, f_hid), lambda i: (0, 0)),
            pl.BlockSpec((1, f_hid), lambda i: (0, 0)),
            pl.BlockSpec((f_hid, f_out), lambda i: (0, 0)),
            pl.BlockSpec((1, f_out), lambda i: (0, 0)),
        ],
        out_specs=pl.BlockSpec((N, f_out), lambda i: (0, 0)),
        scratch_shapes=[pltpu.VMEM((N, f_hid), jnp.bfloat16)],
        compiler_params=pltpu.CompilerParams(
            dimension_semantics=("arbitrary",),
            vmem_limit_bytes=32 * 1024 * 1024,  # safe on v5e/v6e/v7x; plenty here
        ),
    )(Xp, Ab, w1p, b1p, w2p, b2p)

    # Slice away lane padding, then (N, y) -> (B, S, y) -> (B, y, S).
    out = out[:, :y_dim]
    return jnp.transpose(out.reshape(B, sensors, y_dim), (0, 2, 1))


def _reference(x_input, edge_index, params, *, sensors, x_dim, y_dim):
    """Pure-JAX f32 reference with the full dense N×N Â (independent check of
    the block-structure optimization)."""
    B = x_input.shape[0]
    N = B * sensors
    X = jnp.transpose(x_input, (0, 2, 1)).reshape(N, x_dim)
    src, dst = edge_index[0], edge_index[1]
    A = jnp.zeros((N, N), jnp.float32).at[dst, src].add(1.0)
    A = A.at[jnp.arange(N), jnp.arange(N)].add(1.0)
    dinv = jax.lax.rsqrt(jnp.sum(A, axis=1))
    An = dinv[:, None] * A * dinv[None, :]
    w1, b1, w2, b2 = params
    h1 = jnp.maximum(An @ (X @ w1) + b1, 0.0)
    h2 = An @ (h1 @ w2) + b2
    return jnp.transpose(h2.reshape(B, sensors, y_dim), (0, 2, 1))


if __name__ == "__main__":
    # Small shapes consistent with the module.
    batch, sensors, x_dim, y_dim, hidden = 2, 8, 16, 4, 32

    # Deterministic ring graph over the `sensors` nodes (both directions).
    s = np.arange(sensors)
    edge_index = jnp.asarray(
        np.stack(
            [
                np.concatenate([s, (s + 1) % sensors]),
                np.concatenate([(s + 1) % sensors, s]),
            ]
        ),
        dtype=jnp.int32,
    )

    # Parameters: nn.init.constant_(p, 0.01) on every parameter.
    # GCNConv.lin.weight is (out, in); forward applies x @ W^T, so store W^T.
    w1 = jnp.full((x_dim, hidden), 0.01, jnp.float32)
    b1 = jnp.full((1, hidden), 0.01, jnp.float32)
    w2 = jnp.full((hidden, y_dim), 0.01, jnp.float32)
    b2 = jnp.full((1, y_dim), 0.01, jnp.float32)
    params = (w1, b1, w2, b2)

    # Hoisted out of the forward path (static graph / static weights).
    a_norm = build_normalized_adjacency(edge_index, sensors)
    padded_params = prepare_params(params, x_dim=x_dim, hidden=hidden, y_dim=y_dim)

    key = jax.random.PRNGKey(0)
    x_input = jax.random.normal(key, (batch, x_dim, sensors), dtype=jnp.float32)

    out = scgnn_forward(
        x_input, a_norm, padded_params, sensors=sensors, x_dim=x_dim, y_dim=y_dim
    )
    out = jax.block_until_ready(out)

    ref = _reference(
        x_input, edge_index, params, sensors=sensors, x_dim=x_dim, y_dim=y_dim
    )
    assert out.shape == (batch, y_dim, sensors)
    # bf16 MXU operands with f32 accumulation -> looser tolerance vs f32 ref.
    np.testing.assert_allclose(np.asarray(out), np.asarray(ref), rtol=2e-2, atol=1e-3)

    print("KERNEL_OK")
</pallas_src>

<mosaic_0001>
module attributes {stable_mosaic.version = 11 : i64} {
  func.func @scgnn_kernel(%arg0: i32, %arg1: memref<16x128xbf16, #tpu.memory_space<vmem>>, %arg2: memref<8x8xbf16, #tpu.memory_space<vmem>>, %arg3: memref<128x128xbf16, #tpu.memory_space<vmem>>, %arg4: memref<1x128xf32, #tpu.memory_space<vmem>>, %arg5: memref<128x128xbf16, #tpu.memory_space<vmem>>, %arg6: memref<1x128xf32, #tpu.memory_space<vmem>>, %arg7: memref<16x128xf32, #tpu.memory_space<vmem>>, %arg8: memref<16x128xbf16, #tpu.memory_space<vmem>>) attributes {dimension_semantics = [#tpu.dimension_semantics<arbitrary>], iteration_bounds = array<i64: 1>, scalar_prefetch = 0 : i64, scratch_operands = 1 : i64, tpu.core_type = #tpu.core_type<tc>, window_params = [{pipeline_mode = #tpu.pipeline_mode<synchronous>, transform_indices = @transform_0, window_bounds = array<i64: 16, 128>}, {pipeline_mode = #tpu.pipeline_mode<synchronous>, transform_indices = @transform_1, window_bounds = array<i64: 8, 8>}, {pipeline_mode = #tpu.pipeline_mode<synchronous>, transform_indices = @transform_2, window_bounds = array<i64: 128, 128>}, {pipeline_mode = #tpu.pipeline_mode<synchronous>, transform_indices = @transform_3, window_bounds = array<i64: 1, 128>}, {pipeline_mode = #tpu.pipeline_mode<synchronous>, transform_indices = @transform_4, window_bounds = array<i64: 128, 128>}, {pipeline_mode = #tpu.pipeline_mode<synchronous>, transform_indices = @transform_5, window_bounds = array<i64: 1, 128>}, {pipeline_mode = #tpu.pipeline_mode<synchronous>, transform_indices = @transform_6, window_bounds = array<i64: 16, 128>}]} {
    %c0 = arith.constant 0 : index
    %c0_0 = arith.constant 0 : index
    %0 = vector.load %arg1[%c0, %c0_0] : memref<16x128xbf16, #tpu.memory_space<vmem>>, vector<16x128xbf16>
    %c0_1 = arith.constant 0 : index
    %c0_2 = arith.constant 0 : index
    %1 = vector.load %arg2[%c0_1, %c0_2] : memref<8x8xbf16, #tpu.memory_space<vmem>>, vector<8x8xbf16>
    %c0_3 = arith.constant 0 : index
    %c0_4 = arith.constant 0 : index
    %2 = vector.load %arg3[%c0_3, %c0_4] : memref<128x128xbf16, #tpu.memory_space<vmem>>, vector<128x128xbf16>
    %c0_5 = arith.constant 0 : index
    %c0_6 = arith.constant 0 : index
    %3 = vector.load %arg5[%c0_5, %c0_6] : memref<128x128xbf16, #tpu.memory_space<vmem>>, vector<128x128xbf16>
    %c0_7 = arith.constant 0 : index
    %c0_8 = arith.constant 0 : index
    %4 = vector.load %arg4[%c0_7, %c0_8] : memref<1x128xf32, #tpu.memory_space<vmem>>, vector<1x128xf32>
    %c0_9 = arith.constant 0 : index
    %c0_10 = arith.constant 0 : index
    %5 = vector.load %arg6[%c0_9, %c0_10] : memref<1x128xf32, #tpu.memory_space<vmem>>, vector<1x128xf32>
    %cst = arith.constant dense<0.000000e+00> : vector<16x128xf32>
    %6 = tpu.matmul %0, %2, %cst {dimension_numbers = #tpu.dot_dimension_numbers<[1], [0], [0], [1], [0, 0, 1, 1], [], []>} : vector<16x128xbf16>, vector<128x128xbf16>, vector<16x128xf32> -> vector<16x128xf32>
    %7 = vector.extract_strided_slice %6 {offsets = [0, 0], sizes = [8, 128], strides = [1, 1]} : vector<16x128xf32> to vector<8x128xf32>
    %8 = arith.truncf %7 : vector<8x128xf32> to vector<8x128xbf16>
    %cst_11 = arith.constant dense<0.000000e+00> : vector<8x128xf32>
    %9 = tpu.matmul %1, %8, %cst_11 {dimension_numbers = #tpu.dot_dimension_numbers<[1], [0], [0], [1], [0, 0, 1, 1], [], []>} : vector<8x8xbf16>, vector<8x128xbf16>, vector<8x128xf32> -> vector<8x128xf32>
    %10 = vector.broadcast %4 : vector<1x128xf32> to vector<8x128xf32>
    %11 = arith.addf %9, %10 : vector<8x128xf32>
    %cst_12 = arith.constant 0.000000e+00 : f32
    %12 = vector.broadcast %cst_12 : f32 to vector<8x128xf32>
    %13 = arith.maximumf %11, %12 : vector<8x128xf32>
    %14 = arith.truncf %13 : vector<8x128xf32> to vector<8x128xbf16>
    %c0_13 = arith.constant 0 : index
    %c0_14 = arith.constant 0 : index
    %15 = vector.load %arg8[%c0_13, %c0_14] : memref<16x128xbf16, #tpu.memory_space<vmem>>, vector<8x128xbf16>
    tpu.vector_store %arg8[%c0_13, %c0_14], %14 {strides = array<i32>} : memref<16x128xbf16, #tpu.memory_space<vmem>>, vector<8x128xbf16>,
    %16 = vector.extract_strided_slice %6 {offsets = [8, 0], sizes = [8, 128], strides = [1, 1]} : vector<16x128xf32> to vector<8x128xf32>
    %17 = vector.broadcast %4 : vector<1x128xf32> to vector<8x128xf32>
    %18 = arith.addf %16, %17 : vector<8x128xf32>
    %cst_15 = arith.constant 0.000000e+00 : f32
    %19 = vector.broadcast %cst_15 : f32 to vector<8x128xf32>
    %20 = arith.maximumf %18, %19 : vector<8x128xf32>
    %21 = arith.truncf %20 : vector<8x128xf32> to vector<8x128xbf16>
    %c8 = arith.constant 8 : index
    %c0_16 = arith.constant 0 : index
    %22 = vector.load %arg8[%c8, %c0_16] : memref<16x128xbf16, #tpu.memory_space<vmem>>, vector<8x128xbf16>
    tpu.vector_store %arg8[%c8, %c0_16], %21 {strides = array<i32>} : memref<16x128xbf16, #tpu.memory_space<vmem>>, vector<8x128xbf16>,
    %c0_17 = arith.constant 0 : index
    %c0_18 = arith.constant 0 : index
    %23 = vector.load %arg8[%c0_17, %c0_18] : memref<16x128xbf16, #tpu.memory_space<vmem>>, vector<16x128xbf16>
    %cst_19 = arith.constant dense<0.000000e+00> : vector<16x128xf32>
    %24 = tpu.matmul %23, %3, %cst_19 {dimension_numbers = #tpu.dot_dimension_numbers<[1], [0], [0], [1], [0, 0, 1, 1], [], []>} : vector<16x128xbf16>, vector<128x128xbf16>, vector<16x128xf32> -> vector<16x128xf32>
    %25 = vector.extract_strided_slice %24 {offsets = [0, 0], sizes = [8, 128], strides = [1, 1]} : vector<16x128xf32> to vector<8x128xf32>
    %26 = arith.truncf %25 : vector<8x128xf32> to vector<8x128xbf16>
    %cst_20 = arith.constant dense<0.000000e+00> : vector<8x128xf32>
    %27 = tpu.matmul %1, %26, %cst_20 {dimension_numbers = #tpu.dot_dimension_numbers<[1], [0], [0], [1], [0, 0, 1, 1], [], []>} : vector<8x8xbf16>, vector<8x128xbf16>, vector<8x128xf32> -> vector<8x128xf32>
    %28 = vector.broadcast %5 : vector<1x128xf32> to vector<8x128xf32>
    %29 = arith.addf %27, %28 : vector<8x128xf32>
    %c0_21 = arith.constant 0 : index
    %c0_22 = arith.constant 0 : index
    %30 = vector.load %arg7[%c0_21, %c0_22] : memref<16x128xf32, #tpu.memory_space<vmem>>, vector<8x128xf32>
    tpu.vector_store %arg7[%c0_21, %c0_22], %29 {strides = array<i32>} : memref<16x128xf32, #tpu.memory_space<vmem>>, vector<8x128xf32>,
    %31 = vector.extract_strided_slice %24 {offsets = [8, 0], sizes = [8, 128], strides = [1, 1]} : vector<16x128xf32> to vector<8x128xf32>
    %32 = vector.broadcast %5 : vector<1x128xf32> to vector<8x128xf32>
    %33 = arith.addf %31, %32 : vector<8x128xf32>
    %c8_23 = arith.constant 8 : index
    %c0_24 = arith.constant 0 : index
    %34 = vector.load %arg7[%c8_23, %c0_24] : memref<16x128xf32, #tpu.memory_space<vmem>>, vector<8x128xf32>
    tpu.vector_store %arg7[%c8_23, %c0_24], %33 {strides = array<i32>} : memref<16x128xf32, #tpu.memory_space<vmem>>, vector<8x128xf32>,
    return
  }
  func.func @transform_0(%arg0: i32) -> (i32, i32) {
    %c0_i32 = arith.constant 0 : i32
    %c0_i32_0 = arith.constant 0 : i32
    %c0_i32_1 = arith.constant 0 : i32
    return %c0_i32, %c0_i32_0 : i32, i32
  }
  func.func @transform_1(%arg0: i32) -> (i32, i32) {
    %c0_i32 = arith.constant 0 : i32
    %c0_i32_0 = arith.constant 0 : i32
    %c0_i32_1 = arith.constant 0 : i32
    return %c0_i32, %c0_i32_0 : i32, i32
  }
  func.func @transform_2(%arg0: i32) -> (i32, i32) {
    %c0_i32 = arith.constant 0 : i32
    %c0_i32_0 = arith.constant 0 : i32
    %c0_i32_1 = arith.constant 0 : i32
    return %c0_i32, %c0_i32_0 : i32, i32
  }
  func.func @transform_3(%arg0: i32) -> (i32, i32) {
    %c0_i32 = arith.constant 0 : i32
    %c0_i32_0 = arith.constant 0 : i32
    %c0_i32_1 = arith.constant 0 : i32
    return %c0_i32, %c0_i32_0 : i32, i32
  }
  func.func @transform_4(%arg0: i32) -> (i32, i32) {
    %c0_i32 = arith.constant 0 : i32
    %c0_i32_0 = arith.constant 0 : i32
    %c0_i32_1 = arith.constant 0 : i32
    return %c0_i32, %c0_i32_0 : i32, i32
  }
  func.func @transform_5(%arg0: i32) -> (i32, i32) {
    %c0_i32 = arith.constant 0 : i32
    %c0_i32_0 = arith.constant 0 : i32
    %c0_i32_1 = arith.constant 0 : i32
    return %c0_i32, %c0_i32_0 : i32, i32
  }
  func.func @transform_6(%arg0: i32) -> (i32, i32) {
    %c0_i32 = arith.constant 0 : i32
    %c0_i32_0 = arith.constant 0 : i32
    %c0_i32_1 = arith.constant 0 : i32
    return %c0_i32, %c0_i32_0 : i32, i32
  }
}

</mosaic_0001>

<bundles_post_ra>
// kernel: tpu_custom_call.1
= control target key start
LH: loop header
LB: loop body
LE: loop exit
PB: predicated region body
PF: predicated region fallthrough
CT: control target
= control target key end

     0   :  { %11 = vsyncpa [#allocation4], 0  ;;  %s843_s0 = inlined_call_operand.hbm [shape: bf16[16,128], index: 0, kind: input, shape index: {}]   ;;  %s844_s1 = inlined_call_operand.hbm [shape: bf16[8,8], index: 1, kind: input, shape index: {}]   ;;  %s845_s2 = inlined_call_operand.hbm [shape: bf16[128,128], index: 2, kind: input, shape index: {}]   ;;  %s846_s3 = inlined_call_operand.vmem [shape: f32[1,128], index: 3, kind: input, shape index: {}]   ;;  %s847_s4 = inlined_call_operand.hbm [shape: bf16[128,128], index: 4, kind: input, shape index: {}]   ;;  %s848_s5 = inlined_call_operand.vmem [shape: f32[1,128], index: 5, kind: input, shape index: {}]   ;;  %s849_s6 = inlined_call_operand.hbm [shape: f32[16,128], index: 6, kind: output, shape index: {}]  }
   0x1   :  { %12 = vsyncpa [#allocation7], 0 }
   0x2   :  { %13 = vsyncpa [#allocation10], 0 }
   0x3   :  { %14 = vsyncpa [#allocation5], 0  ;;  %s678_s21 = smov [#allocation6]   ;;  %s679_s23 = smov [#allocation3]  }
   0x4   :  { %s33_s22 = sshll.u32 %s678_s21, 4  ;;  %s20_s24 = sshll.u32 %s679_s23, 4  ;;  %s34_s22 = int_to_ptr.vmem [resolvable:$true] %s33_s22  ;;  %s724_s24 = int_to_ptr.vmem [resolvable:$true] %s20_s24 }
   0x5   :  { %s560_s27 = scalar_lea.hbm %s844_s1, 64 }
   0x6   :  { %p561_p0 = scmp.ne.s32.totalorder %s844_s1, %s560_s27  ;;  %p564_p1 = scmp.lt.u32.totalorder %s560_s27, %s844_s1 }
   0x8   :  { %p566_p2 = pnand %p564_p1, %p561_p0 }
   0xa   :  { %569 = shalt.err (!%p566_p2)
}
   0xb   :  { %s570_s8 = scalar_lea.vmem %s34_s22, 64  ;;  %p575_p4 = scmp.lt.s32.totalorder %s34_s22, %s34_s22 }
   0xc   :  { %p571_p3 = scmp.ne.s32.totalorder %s34_s22, %s570_s8  ;;  %p576_p5 = scmp.lt.s32.totalorder %s570_s8, %s570_s8 }
   0xe   :  { %p577_p6 = por %p576_p5, %p575_p4 }
  0x10   :  { %p578_p7 = pnand %p577_p6, %p571_p3 }
  0x12   :  { %581 = shalt.err (!%p578_p7)
}
  0x13   :  { %36 = dma.hbm_to_vmem [thread:$0]  %s844_s1, 64, %s34_s22, [#allocation7]  }
  0x14   :  { %s582_s13 = scalar_lea.hbm %s843_s0, 128 }
  0x15   :  { %p583_p8 = scmp.ne.s32.totalorder %s843_s0, %s582_s13  ;;  %p586_p9 = scmp.lt.u32.totalorder %s582_s13, %s843_s0 }
  0x17   :  { %p588_p10 = pnand %p586_p9, %p583_p8 }
  0x19   :  { %591 = shalt.err (!%p588_p10)
}
  0x1a   :  { %s592_s18 = scalar_lea.vmem %s724_s24, 128  ;;  %p597_p12 = scmp.lt.s32.totalorder %s724_s24, %s724_s24 }
  0x1b   :  { %p593_p11 = scmp.ne.s32.totalorder %s724_s24, %s592_s18  ;;  %p598_p13 = scmp.lt.s32.totalorder %s592_s18, %s592_s18 }
  0x1d   :  { %p599_p0 = por %p598_p13, %p597_p12 }
  0x1f   :  { %p600_p1 = pnand %p599_p0, %p593_p11 }
  0x21   :  { %603 = shalt.err (!%p600_p1)
}
  0x22   :  { %s680_s1 = smov 64   ;;  %s681_s19 = smov 4  }
  0x23   :  { %26 = dma.hbm_to_vmem [thread:$0]  %s843_s0, 128, %s724_s24, [#allocation4], %s680_s1, %s680_s1, %s681_s19  }
  0x24   :  { %s682_s22 = smov [#allocation8]   ;;  %s683_s25 = smov [#allocation9]  }
  0x25   :  { %s42_s23 = sshll.u32 %s682_s22, 4  ;;  %s56_s26 = sshll.u32 %s683_s25, 4  ;;  %s43_s23 = int_to_ptr.vmem [resolvable:$true] %s42_s23  ;;  %s758_s26 = int_to_ptr.vmem [resolvable:$true] %s56_s26 }
  0x26   :  { %s604_s29 = scalar_lea.hbm %s845_s2, 1024 }
  0x27   :  { %p605_p2 = scmp.ne.s32.totalorder %s845_s2, %s604_s29  ;;  %p608_p3 = scmp.lt.u32.totalorder %s604_s29, %s845_s2 }
  0x29   :  { %p610_p4 = pnand %p608_p3, %p605_p2 }
  0x2b   :  { %613 = shalt.err (!%p610_p4)
}
  0x2c   :  { %s614_s0 = scalar_lea.vmem %s43_s23, 1024  ;;  %p619_p6 = scmp.lt.s32.totalorder %s43_s23, %s43_s23 }
  0x2d   :  { %p615_p5 = scmp.ne.s32.totalorder %s43_s23, %s614_s0  ;;  %p620_p7 = scmp.lt.s32.totalorder %s614_s0, %s614_s0 }
  0x2f   :  { %p621_p8 = por %p620_p7, %p619_p6 }
  0x31   :  { %p622_p9 = pnand %p621_p8, %p615_p5 }
  0x33   :  { %625 = shalt.err (!%p622_p9)
}
  0x34   :  { %48 = dma.hbm_to_vmem [thread:$0]  %s845_s2, 1024, %s43_s23, [#allocation7], %s680_s1, %s680_s1, %s681_s19  }
  0x35   :  { %s626_s13 = scalar_lea.hbm %s847_s4, 1024 }
  0x36   :  { %p627_p10 = scmp.ne.s32.totalorder %s847_s4, %s626_s13  ;;  %p630_p11 = scmp.lt.u32.totalorder %s626_s13, %s847_s4 }
  0x38   :  { %p632_p12 = pnand %p630_p11, %p627_p10 }
  0x3a   :  { %635 = shalt.err (!%p632_p12)
}
  0x3b   :  { %s636_s18 = scalar_lea.vmem %s758_s26, 1024  ;;  %p641_p0 = scmp.lt.s32.totalorder %s758_s26, %s758_s26 }
  0x3c   :  { %p637_p13 = scmp.ne.s32.totalorder %s758_s26, %s636_s18  ;;  %p642_p1 = scmp.lt.s32.totalorder %s636_s18, %s636_s18 }
  0x3e   :  { %p643_p2 = por %p642_p1, %p641_p0 }
  0x40   :  { %p644_p3 = pnand %p643_p2, %p637_p13 }
  0x42   :  { %647 = shalt.err (!%p644_p3)
}
  0x43   :  { %62 = dma.hbm_to_vmem [thread:$0]  %s847_s4, 1024, %s758_s26, [#allocation10], %s680_s1, %s680_s1, %s681_s19  }
  0x44   :  { %670 = dma.done.wait [#allocation4], 128  }
  0x45   :  { %671 = vsyncadd [#allocation4], 4294967168 }
  0x46   :  { %672 = dma.done.wait [#allocation7], 1088  }
  0x47   :  { %673 = vsyncadd [#allocation7], 4294966208 }
  0x48   :  { %674 = dma.done.wait [#allocation10], 1024  }
  0x49   :  { %675 = vsyncadd [#allocation10], 4294966272  ;;  %v684_v0 = vmov 0.0   ;;  %vm685_vm0 = vmmov 0   ;;  %v543_v1 = vld [vmem:[#allocation8] sm:$0xff]   ;;  %v544_v2 = vld [vmem:[#allocation8 + $0x8] sm:$0xff]  }
  0x4a   :  { %480 = vmatprep.subr.bf16.mxu0 %v684_v0  ;;  %496 = vmatprep.mubr.msk.bf16.mxu0 %vm685_vm0, %v684_v0  ;;  %v545_v3 = vld [vmem:[#allocation8 + $0x10] sm:$0xff]   ;;  %v546_v4 = vld [vmem:[#allocation8 + $0x18] sm:$0xff]   ;;  %v547_v5 = vld [vmem:[#allocation8 + $0x20] sm:$0xff]   ;;  %vm221_vm1 = vcmask 1043456   ;;  %vm217_vm2 = vcmask 64512   ;;  %s686_s21 = smov [#allocation11]  }
  0x4b   :  { %500 = vmatprep.subr.bf16.mxu1 %v684_v0  ;;  %502 = vmatprep.mubr.msk.bf16.mxu1 %vm685_vm0, %v684_v0  ;;  %v548_v6 = vld [vmem:[#allocation8 + $0x28] sm:$0xff]   ;;  %v549_v7 = vld [vmem:[#allocation8 + $0x30] sm:$0xff]   ;;  %v550_v8 = vld [vmem:[#allocation8 + $0x38] sm:$0xff]   ;;  %s423_s22 = sshll.u32 %s686_s21, 4  ;;  %s424_s22 = int_to_ptr.vmem [resolvable:$true] %s423_s22 }
  0x4c   :  { %481 = vmatpush3.bf16.msra.mxu0 %v543_v1  ;;  %v551_v9 = vld [vmem:[#allocation3] sm:$0xff]   ;;  %v446_v11 = vld [vmem:[%s846_s3] ss:$0 sm:$0xff]  ;;  %v80_v18 = vld [vmem:[#allocation6] sm:$0xf]  ;;  %p653_p5 = scmp.lt.s32.totalorder %s424_s22, %s424_s22 }
  0x4d   :  { %482 = vmatprep.subr.bf16.mxu0 %v684_v0  ;;  %v552_v19 = vld [vmem:[#allocation9] sm:$0xff]   ;;  %v553_v22 = vld [vmem:[#allocation9 + $0x8] sm:$0xff]   ;;  %v554_v24 = vld [vmem:[#allocation9 + $0x10] sm:$0xff]  }
  0x4e   :  { %v555_v25 = vld [vmem:[#allocation9 + $0x18] sm:$0xff]   ;;  %v556_v26 = vld [vmem:[#allocation9 + $0x20] sm:$0xff]   ;;  %v557_v27 = vld [vmem:[#allocation9 + $0x28] sm:$0xff]  }
  0x4f   :  { %v558_v28 = vld [vmem:[#allocation9 + $0x30] sm:$0xff]   ;;  %v559_v29 = vld [vmem:[#allocation9 + $0x38] sm:$0xff]   ;;  %v456_v39 = vld [vmem:[%s848_s5] ss:$0 sm:$0xff]  ;;  %s648_s5 = scalar_lea.vmem %s424_s22, 256 }
  0x50   :  { %483 = vmatpush3.bf16.msra.mxu0 %v544_v2  ;;  %p649_p4 = scmp.ne.s32.totalorder %s424_s22, %s648_s5  ;;  %p654_p6 = scmp.lt.s32.totalorder %s648_s5, %s648_s5 }
  0x51   :  { %484 = vmatprep.subr.bf16.mxu0 %v684_v0 }
  0x52   :  { %p655_p7 = por %p654_p6, %p653_p5 }
  0x54   :  { %485 = vmatpush3.bf16.msra.mxu0 %v545_v3  ;;  %p656_p8 = pnand %p655_p7, %p649_p4 }
  0x55   :  { %486 = vmatprep.subr.bf16.mxu0 %v684_v0 }
  0x58   :  { %487 = vmatpush3.bf16.msra.mxu0 %v546_v4 }
  0x59   :  { %488 = vmatprep.subr.bf16.mxu0 %v684_v0 }
  0x5c   :  { %489 = vmatpush3.bf16.msra.mxu0 %v547_v5 }
  0x5d   :  { %490 = vmatprep.subr.bf16.mxu0 %v684_v0 }
  0x60   :  { %491 = vmatpush3.bf16.msra.mxu0 %v548_v6 }
  0x61   :  { %492 = vmatprep.subr.bf16.mxu0 %v684_v0 }
  0x64   :  { %493 = vmatpush3.bf16.msra.mxu0 %v549_v7 }
  0x65   :  { %494 = vmatprep.subr.bf16.mxu0 %v684_v0 }
  0x68   :  { %495 = vmatpush3.bf16.msra.mxu0 %v550_v8 }
  0x69   :  { %526 = vmatprep.subr.bf16.mxu0 %v684_v0 }
  0x6b   :  { %497 = vmatmul.mubr.bf16.vlgmr.msra.gmra.mrb[0].mxu0 %v551_v9 }
  0x6c   :  { %528 = vmatprep.mubr.msk.bf16.mxu0 %vm685_vm0, %v684_v0 }
 0x13e   :  { %v203_v10 = vpop.f32.mrb[0].mxu0 }
 0x13f   :  { %v210_v12 = vpack.c.bf16 %v203_v10, %v203_v10  ;;  %v498_v13 = vpop.f32.mrb[1].mxu0 }
 0x140   :  { %v206_v14 = vpop.f32.mrb[2].mxu0 }
 0x141   :  { %v268_v15 = vadd.f32 %v446_v11, %v206_v14  ;;  %v499_v16 = vpop.f32.mrb[3].mxu0  ;;  %v223_v17 = vsel %vm221_vm1, %v210_v12, 0 }
 0x142   :  { %501 = vmatpush3.bf16.msra.mxu1 %v223_v17 }
 0x143   :  { %v269_v20 = vmax.f32 %v268_v15, 0.0  ;;  %506 = vmatprep.subr.bf16.mxu1 %v684_v0 }
 0x145   :  { %v270_v21 = vpack.c.bf16 %v269_v20, %v269_v20  ;;  %503 = vmatmul.mubr.msk.bf16.vlgmr.msra.gmra.mrb[0].mxu1 %vm217_vm2, %v80_v18 }
 0x146   :  { %507 = vmatpush3.bf16.msra.mxu1 %v552_v19  ;;  %522 = vmatprep.mubr.msk.bf16.mxu1 %vm685_vm0, %v684_v0 }
 0x147   :  { %v272_v23 = vrot.slane %v270_v21, 4  ;;  %508 = vmatprep.subr.bf16.mxu1 %v684_v0 }
 0x149   :  { %274 = vst [vmem:[#allocation2] sm:$0xf0] %v272_v23 }
 0x14a   :  { %509 = vmatpush3.bf16.msra.mxu1 %v553_v22 }
 0x14b   :  { %510 = vmatprep.subr.bf16.mxu1 %v684_v0 }
 0x14e   :  { %511 = vmatpush3.bf16.msra.mxu1 %v554_v24 }
 0x14f   :  { %512 = vmatprep.subr.bf16.mxu1 %v684_v0 }
 0x152   :  { %513 = vmatpush3.bf16.msra.mxu1 %v555_v25 }
 0x153   :  { %514 = vmatprep.subr.bf16.mxu1 %v684_v0 }
 0x156   :  { %515 = vmatpush3.bf16.msra.mxu1 %v556_v26 }
 0x157   :  { %516 = vmatprep.subr.bf16.mxu1 %v684_v0 }
 0x15a   :  { %517 = vmatpush3.bf16.msra.mxu1 %v557_v27 }
 0x15b   :  { %518 = vmatprep.subr.bf16.mxu1 %v684_v0 }
 0x15e   :  { %519 = vmatpush3.bf16.msra.mxu1 %v558_v28 }
 0x15f   :  { %520 = vmatprep.subr.bf16.mxu1 %v684_v0 }
 0x162   :  { %521 = vmatpush3.bf16.msra.mxu1 %v559_v29 }
 0x218   :  { %v259_v30 = vpop.f32.mrb[0].mxu1 }
 0x219   :  { %v260_v31 = vadd.f32 %v446_v11, %v259_v30  ;;  %v504_v32 = vpop.f32.mrb[1].mxu1 }
 0x21a   :  { %v262_v33 = vpop.f32.mrb[2].mxu1 }
 0x21b   :  { %v265_v34 = vmax.f32 %v260_v31, 0.0  ;;  %v505_v35 = vpop.f32.mrb[3].mxu1 }
 0x21d   :  { %v266_v36 = vpack.c.bf16 %v265_v34, %v265_v34 }
 0x21f   :  { %267 = vst [vmem:[#allocation2] sm:$0xf] %v266_v36 }
 0x226   :  { %v275_v37 = vld [vmem:[#allocation2] sm:$0xff] }
 0x227   :  { %523 = vmatmul.mubr.bf16.vlgmr.msra.gmra.mrb[4].mxu1 %v275_v37 }
 0x2fa   :  { %v358_v38 = vpop.f32.mrb[4].mxu1 }
 0x2fb   :  { %v365_v40 = vpack.c.bf16 %v358_v38, %v358_v38  ;;  %v524_v41 = vpop.f32.mrb[5].mxu1 }
 0x2fc   :  { %v361_v42 = vpop.f32.mrb[6].mxu1 }
 0x2fd   :  { %v373_v43 = vsel %vm221_vm1, %v365_v40, 0  ;;  %v416_v44 = vadd.f32 %v456_v39, %v361_v42  ;;  %v525_v45 = vpop.f32.mrb[7].mxu1 }
 0x2fe   :  { %527 = vmatpush3.bf16.msra.mxu0 %v373_v43 }
 0x2ff   :  { %417 = vst [vmem:[#allocation11 + $0x8] sm:$0xff] %v416_v44 }
 0x301   :  { %529 = vmatmul.mubr.msk.bf16.vlgmr.msra.gmra.mrb[4].mxu0 %vm217_vm2, %v80_v18 }
 0x3d4   :  { %v409_v46 = vpop.f32.mrb[4].mxu0 }
 0x3d5   :  { %v410_v47 = vadd.f32 %v456_v39, %v409_v46  ;;  %v530_v48 = vpop.f32.mrb[5].mxu0 }
 0x3d6   :  { %v412_v49 = vpop.f32.mrb[6].mxu0 }
 0x3d7   :  { %415 = vst [vmem:[#allocation11] sm:$0xff] %v410_v47  ;;  %v531_v50 = vpop.f32.mrb[7].mxu0 }
 0x3d8   :  { %659 = shalt.err (!%p656_p8)
}
 0x3d9   :  { %s660_s26 = scalar_lea.hbm %s849_s6, 256 }
 0x3da   :  { %p661_p9 = scmp.ne.s32.totalorder %s849_s6, %s660_s26  ;;  %p664_p10 = scmp.lt.u32.totalorder %s660_s26, %s849_s6 }
 0x3dc   :  { %p666_p11 = pnand %p664_p10, %p661_p9 }
 0x3de   :  { %669 = shalt.err (!%p666_p11)
}
 0x3df   :  { %s687_s7 = smov 128   ;;  %s688_s8 = smov 8  }
 0x3e0   :  { %429 = dma.vmem_to_hbm [thread:$0]  %s424_s22, 256, %s849_s6, [#allocation5], %s687_s7, %s687_s7, %s688_s8  }
 0x3e1   :  { %676 = dma.done.wait [#allocation5], 256  }
 0x3e2   :  { %677 = vsyncadd [#allocation5], 4294967040 }
 0x3e3   :  { %433 = vsyncpa [#allocation4], 1 }
 0x3e4   :  { %434 = vsyncpa [#allocation7], 1 }
 0x3e5   :  { %435 = vsyncpa [#allocation10], 1 }
 0x3e6   :  { %436 = vsyncpa [#allocation5], 1 }

</bundles_post_ra>
